<compile_context>
chip_gen: v7x
topology: tpu7x:2x2x1
jax: 0.10.0
libtpu: 0.0.40
codegen_flags: <defaults>
</compile_context>

<pallas_src>
import jax
import jax.numpy as jnp
from jax.experimental import pallas as pl
from jax.experimental.pallas import tpu as pltpu


def _gcn_fused_kernel(adj_ref, x_ref, ss_ref, *refs):
    """refs = (w0, w1, ..., w6, o_ref); ss_ref is the packed (7,2,MAXF) slab."""
    o_ref = refs[-1]
    w_refs = refs[:-1]
    num_layers = len(w_refs)

    adj = adj_ref[...]          # bf16 (N, N), loaded once, reused for all layers
    h = x_ref[...]              # f32  (N, F0); intermediates stay in VMEM/vregs

    for li in range(num_layers):
        w = w_refs[li][...]                 # bf16 (f_in, f_out)
        f_in, f_out = w.shape
        ss = ss_ref[li]                     # f32 (2, MAXF): row0=scale, row1=shift+bias
        scale = ss[0:1, :f_out]
        shift = ss[1:2, :f_out]

        h_bf = h.astype(jnp.bfloat16)
        if f_in <= f_out:
            # Expanding layer: aggregate first, then project.
            ax = jnp.dot(adj, h_bf, preferred_element_type=jnp.float32)
            h = jnp.dot(ax.astype(jnp.bfloat16), w,
                        preferred_element_type=jnp.float32)
        else:
            # Contracting layer: project first, then aggregate.
            xw = jnp.dot(h_bf, w, preferred_element_type=jnp.float32)
            h = jnp.dot(adj, xw.astype(jnp.bfloat16),
                        preferred_element_type=jnp.float32)

        # Fused GCNConv-bias + BatchNorm (eval) affine.
        h = h * scale + shift

        if li < num_layers - 1:
            h = jnp.maximum(h, 0.0)        # ReLU
            # TODO(synk): Dropout(p=0.5) after layers 4/5/6 is identity in
            # eval mode; training-mode stochastic mask intentionally omitted.
        else:
            # Final layer: log_softmax over the feature axis, in f32.
            m = jnp.max(h, axis=1, keepdims=True)
            s = h - m
            lse = jnp.log(jnp.sum(jnp.exp(s), axis=1, keepdims=True))
            h = s - lse

    o_ref[...] = h


def gcn_forward(x, adj, weights, ss_all):
    """Run the fused 7-layer GCN forward pass in one pallas_call."""
    n = x.shape[0]
    num_classes = weights[-1].shape[1]

    adj_bf16 = adj.astype(jnp.bfloat16)

    def full(shape):
        return pl.BlockSpec(shape, lambda *_: (0,) * len(shape))

    flat_inputs = [adj_bf16, x, ss_all] + list(weights)
    in_specs = [full(a.shape) for a in flat_inputs]

    return pl.pallas_call(
        _gcn_fused_kernel,
        out_shape=jax.ShapeDtypeStruct((n, num_classes), jnp.float32),
        grid=(1,),
        in_specs=in_specs,
        out_specs=pl.BlockSpec((n, num_classes), lambda i: (0, 0)),
        compiler_params=pltpu.CompilerParams(vmem_limit_bytes=32 * 1024 * 1024),
    )(*flat_inputs)


def make_params(key, num_node_features, num_classes):
    """Synthetic params matching the PyTorch module.

    Returns (weights, ss_all):
      weights: list of 7 bf16 (f_in, f_out) matrices.
      ss_all:  f32 (7, 2, max_f) slab; row 0 = scale, row 1 = bias*scale + shift.
    """
    dims = [num_node_features, 16, 32, 64, 128, 256, 512, num_classes]
    eps = 1e-5
    max_f = max(dims[1:])
    weights = []
    ss_all = jnp.zeros((7, 2, max_f), jnp.float32)
    for li in range(7):
        f_in, f_out = dims[li], dims[li + 1]
        key, kw, kg, kb = jax.random.split(key, 4)
        w = jax.random.normal(kw, (f_in, f_out), jnp.float32) * (1.0 / f_in) ** 0.5
        b = jnp.zeros((f_out,), jnp.float32)            # GCNConv bias
        if li < 6:                                      # layers 1..6 have BN
            gamma = 1.0 + 0.1 * jax.random.normal(kg, (f_out,), jnp.float32)
            beta = 0.1 * jax.random.normal(kb, (f_out,), jnp.float32)
            running_mean = jnp.zeros((f_out,), jnp.float32)
            running_var = jnp.ones((f_out,), jnp.float32)
            scale = gamma / jnp.sqrt(running_var + eps)
            shift = beta - running_mean * scale
        else:                                           # final layer: no BN
            scale = jnp.ones((f_out,), jnp.float32)
            shift = jnp.zeros((f_out,), jnp.float32)
        # Fold conv bias into the affine: (h + b)*scale + shift = h*scale + (b*scale + shift)
        shift = b * scale + shift
        ss_all = ss_all.at[li, 0, :f_out].set(scale)
        ss_all = ss_all.at[li, 1, :f_out].set(shift)
        weights.append(w.astype(jnp.bfloat16))
    return weights, ss_all


def make_normalized_adjacency(num_nodes, edge_index):
    """A_hat = D^{-1/2} (A + I) D^{-1/2}, dense, symmetric edges."""
    a = jnp.zeros((num_nodes, num_nodes), jnp.float32)
    src, dst = edge_index
    a = a.at[src, dst].set(1.0)
    a = a.at[dst, src].set(1.0)
    a = a + jnp.eye(num_nodes, dtype=jnp.float32)       # add self loops
    deg = jnp.sum(a, axis=1)
    d_inv_sqrt = 1.0 / jnp.sqrt(deg)
    return a * d_inv_sqrt[:, None] * d_inv_sqrt[None, :]


if __name__ == "__main__":
    num_nodes = 16
    num_node_features = 8
    num_classes = 8

    key = jax.random.PRNGKey(0)
    k_x, k_p = jax.random.split(key)

    # Deterministic small graph: ring + a few chords.
    src = jnp.arange(num_nodes, dtype=jnp.int32)
    dst = (src + 1) % num_nodes
    chord_src = jnp.array([0, 3, 6, 9], dtype=jnp.int32)
    chord_dst = jnp.array([8, 11, 14, 1], dtype=jnp.int32)
    edge_index = (jnp.concatenate([src, chord_src]),
                  jnp.concatenate([dst, chord_dst]))

    x = jax.random.normal(k_x, (num_nodes, num_node_features), jnp.float32)
    adj = make_normalized_adjacency(num_nodes, edge_index)
    weights, ss_all = make_params(k_p, num_node_features, num_classes)

    out = gcn_forward(x, adj, weights, ss_all)
    out = jax.block_until_ready(out)

    assert out.shape == (num_nodes, num_classes)
    assert bool(jnp.all(jnp.isfinite(out)))
    assert bool(jnp.all(out <= 1e-6))                    # log-probs are <= 0
    # log_softmax rows should (approximately) exponentiate-sum to 1.
    row_sums = jnp.sum(jnp.exp(out), axis=1)
    assert bool(jnp.all(jnp.abs(row_sums - 1.0) < 1e-3))

    print("KERNEL_OK")
</pallas_src>

<mosaic_0001>
module attributes {stable_mosaic.version = 11 : i64} {
  func.func @_gcn_fused_kernel(%arg0: i32, %arg1: memref<16x16xbf16, #tpu.memory_space<vmem>>, %arg2: memref<16x8xf32, #tpu.memory_space<vmem>>, %arg3: memref<7x2x512xf32, #tpu.memory_space<vmem>>, %arg4: memref<8x16xbf16, #tpu.memory_space<vmem>>, %arg5: memref<16x32xbf16, #tpu.memory_space<vmem>>, %arg6: memref<32x64xbf16, #tpu.memory_space<vmem>>, %arg7: memref<64x128xbf16, #tpu.memory_space<vmem>>, %arg8: memref<128x256xbf16, #tpu.memory_space<vmem>>, %arg9: memref<256x512xbf16, #tpu.memory_space<vmem>>, %arg10: memref<512x8xbf16, #tpu.memory_space<vmem>>, %arg11: memref<16x8xf32, #tpu.memory_space<vmem>>) attributes {dimension_semantics = [#tpu.dimension_semantics<arbitrary>], iteration_bounds = array<i64: 1>, scalar_prefetch = 0 : i64, scratch_operands = 0 : i64, tpu.core_type = #tpu.core_type<tc>, window_params = [{pipeline_mode = #tpu.pipeline_mode<synchronous>, transform_indices = @transform_0, window_bounds = array<i64: 16, 16>}, {pipeline_mode = #tpu.pipeline_mode<synchronous>, transform_indices = @transform_1, window_bounds = array<i64: 16, 8>}, {pipeline_mode = #tpu.pipeline_mode<synchronous>, transform_indices = @transform_2, window_bounds = array<i64: 7, 2, 512>}, {pipeline_mode = #tpu.pipeline_mode<synchronous>, transform_indices = @transform_3, window_bounds = array<i64: 8, 16>}, {pipeline_mode = #tpu.pipeline_mode<synchronous>, transform_indices = @transform_4, window_bounds = array<i64: 16, 32>}, {pipeline_mode = #tpu.pipeline_mode<synchronous>, transform_indices = @transform_5, window_bounds = array<i64: 32, 64>}, {pipeline_mode = #tpu.pipeline_mode<synchronous>, transform_indices = @transform_6, window_bounds = array<i64: 64, 128>}, {pipeline_mode = #tpu.pipeline_mode<synchronous>, transform_indices = @transform_7, window_bounds = array<i64: 128, 256>}, {pipeline_mode = #tpu.pipeline_mode<synchronous>, transform_indices = @transform_8, window_bounds = array<i64: 256, 512>}, {pipeline_mode = #tpu.pipeline_mode<synchronous>, transform_indices = @transform_9, window_bounds = array<i64: 512, 8>}, {pipeline_mode = #tpu.pipeline_mode<synchronous>, transform_indices = @transform_10, window_bounds = array<i64: 16, 8>}]} {
    %c0 = arith.constant 0 : index
    %c0_0 = arith.constant 0 : index
    %0 = vector.load %arg1[%c0, %c0_0] : memref<16x16xbf16, #tpu.memory_space<vmem>>, vector<16x16xbf16>
    %c0_1 = arith.constant 0 : index
    %c0_2 = arith.constant 0 : index
    %1 = vector.load %arg2[%c0_1, %c0_2] : memref<16x8xf32, #tpu.memory_space<vmem>>, vector<16x8xf32>
    %c0_3 = arith.constant 0 : index
    %c0_4 = arith.constant 0 : index
    %2 = vector.load %arg4[%c0_3, %c0_4] : memref<8x16xbf16, #tpu.memory_space<vmem>>, vector<8x16xbf16>
    %c0_5 = arith.constant 0 : index
    %c0_6 = arith.constant 0 : index
    %c0_7 = arith.constant 0 : index
    %3 = vector.load %arg3[%c0_5, %c0_6, %c0_7] : memref<7x2x512xf32, #tpu.memory_space<vmem>>, vector<1x2x512xf32>
    %4 = vector.shape_cast %3 : vector<1x2x512xf32> to vector<2x512xf32>
    %5 = vector.extract_strided_slice %4 {offsets = [0, 0], sizes = [1, 16], strides = [1, 1]} : vector<2x512xf32> to vector<1x16xf32>
    %6 = vector.extract_strided_slice %4 {offsets = [1, 0], sizes = [1, 16], strides = [1, 1]} : vector<2x512xf32> to vector<1x16xf32>
    %7 = arith.truncf %1 : vector<16x8xf32> to vector<16x8xbf16>
    %cst = arith.constant dense<0.000000e+00> : vector<16x8xf32>
    %8 = tpu.matmul %0, %7, %cst {dimension_numbers = #tpu.dot_dimension_numbers<[1], [0], [0], [1], [0, 0, 1, 1], [], []>} : vector<16x16xbf16>, vector<16x8xbf16>, vector<16x8xf32> -> vector<16x8xf32>
    %9 = arith.truncf %8 : vector<16x8xf32> to vector<16x8xbf16>
    %cst_8 = arith.constant dense<0.000000e+00> : vector<16x16xf32>
    %10 = tpu.matmul %9, %2, %cst_8 {dimension_numbers = #tpu.dot_dimension_numbers<[1], [0], [0], [1], [0, 0, 1, 1], [], []>} : vector<16x8xbf16>, vector<8x16xbf16>, vector<16x16xf32> -> vector<16x16xf32>
    %11 = vector.broadcast %5 : vector<1x16xf32> to vector<16x16xf32>
    %12 = arith.mulf %10, %11 : vector<16x16xf32>
    %13 = vector.broadcast %6 : vector<1x16xf32> to vector<16x16xf32>
    %14 = arith.addf %12, %13 : vector<16x16xf32>
    %cst_9 = arith.constant 0.000000e+00 : f32
    %15 = vector.broadcast %cst_9 : f32 to vector<16x16xf32>
    %16 = arith.maximumf %14, %15 : vector<16x16xf32>
    %c0_10 = arith.constant 0 : index
    %c0_11 = arith.constant 0 : index
    %17 = vector.load %arg5[%c0_10, %c0_11] : memref<16x32xbf16, #tpu.memory_space<vmem>>, vector<16x32xbf16>
    %c1 = arith.constant 1 : index
    %c0_12 = arith.constant 0 : index
    %c0_13 = arith.constant 0 : index
    %18 = vector.load %arg3[%c1, %c0_12, %c0_13] : memref<7x2x512xf32, #tpu.memory_space<vmem>>, vector<1x2x512xf32>
    %19 = vector.shape_cast %18 : vector<1x2x512xf32> to vector<2x512xf32>
    %20 = vector.extract_strided_slice %19 {offsets = [0, 0], sizes = [1, 32], strides = [1, 1]} : vector<2x512xf32> to vector<1x32xf32>
    %21 = vector.extract_strided_slice %19 {offsets = [1, 0], sizes = [1, 32], strides = [1, 1]} : vector<2x512xf32> to vector<1x32xf32>
    %22 = arith.truncf %16 : vector<16x16xf32> to vector<16x16xbf16>
    %cst_14 = arith.constant dense<0.000000e+00> : vector<16x16xf32>
    %23 = tpu.matmul %0, %22, %cst_14 {dimension_numbers = #tpu.dot_dimension_numbers<[1], [0], [0], [1], [0, 0, 1, 1], [], []>} : vector<16x16xbf16>, vector<16x16xbf16>, vector<16x16xf32> -> vector<16x16xf32>
    %24 = arith.truncf %23 : vector<16x16xf32> to vector<16x16xbf16>
    %cst_15 = arith.constant dense<0.000000e+00> : vector<16x32xf32>
    %25 = tpu.matmul %24, %17, %cst_15 {dimension_numbers = #tpu.dot_dimension_numbers<[1], [0], [0], [1], [0, 0, 1, 1], [], []>} : vector<16x16xbf16>, vector<16x32xbf16>, vector<16x32xf32> -> vector<16x32xf32>
    %26 = vector.broadcast %20 : vector<1x32xf32> to vector<16x32xf32>
    %27 = arith.mulf %25, %26 : vector<16x32xf32>
    %28 = vector.broadcast %21 : vector<1x32xf32> to vector<16x32xf32>
    %29 = arith.addf %27, %28 : vector<16x32xf32>
    %cst_16 = arith.constant 0.000000e+00 : f32
    %30 = vector.broadcast %cst_16 : f32 to vector<16x32xf32>
    %31 = arith.maximumf %29, %30 : vector<16x32xf32>
    %c0_17 = arith.constant 0 : index
    %c0_18 = arith.constant 0 : index
    %32 = vector.load %arg6[%c0_17, %c0_18] : memref<32x64xbf16, #tpu.memory_space<vmem>>, vector<32x64xbf16>
    %c2 = arith.constant 2 : index
    %c0_19 = arith.constant 0 : index
    %c0_20 = arith.constant 0 : index
    %33 = vector.load %arg3[%c2, %c0_19, %c0_20] : memref<7x2x512xf32, #tpu.memory_space<vmem>>, vector<1x2x512xf32>
    %34 = vector.shape_cast %33 : vector<1x2x512xf32> to vector<2x512xf32>
    %35 = vector.extract_strided_slice %34 {offsets = [0, 0], sizes = [1, 64], strides = [1, 1]} : vector<2x512xf32> to vector<1x64xf32>
    %36 = vector.extract_strided_slice %34 {offsets = [1, 0], sizes = [1, 64], strides = [1, 1]} : vector<2x512xf32> to vector<1x64xf32>
    %37 = arith.truncf %31 : vector<16x32xf32> to vector<16x32xbf16>
    %cst_21 = arith.constant dense<0.000000e+00> : vector<16x32xf32>
    %38 = tpu.matmul %0, %37, %cst_21 {dimension_numbers = #tpu.dot_dimension_numbers<[1], [0], [0], [1], [0, 0, 1, 1], [], []>} : vector<16x16xbf16>, vector<16x32xbf16>, vector<16x32xf32> -> vector<16x32xf32>
    %39 = arith.truncf %38 : vector<16x32xf32> to vector<16x32xbf16>
    %cst_22 = arith.constant dense<0.000000e+00> : vector<16x64xf32>
    %40 = tpu.matmul %39, %32, %cst_22 {dimension_numbers = #tpu.dot_dimension_numbers<[1], [0], [0], [1], [0, 0, 1, 1], [], []>} : vector<16x32xbf16>, vector<32x64xbf16>, vector<16x64xf32> -> vector<16x64xf32>
    %41 = vector.broadcast %35 : vector<1x64xf32> to vector<16x64xf32>
    %42 = arith.mulf %40, %41 : vector<16x64xf32>
    %43 = vector.broadcast %36 : vector<1x64xf32> to vector<16x64xf32>
    %44 = arith.addf %42, %43 : vector<16x64xf32>
    %cst_23 = arith.constant 0.000000e+00 : f32
    %45 = vector.broadcast %cst_23 : f32 to vector<16x64xf32>
    %46 = arith.maximumf %44, %45 : vector<16x64xf32>
    %c0_24 = arith.constant 0 : index
    %c0_25 = arith.constant 0 : index
    %47 = vector.load %arg7[%c0_24, %c0_25] : memref<64x128xbf16, #tpu.memory_space<vmem>>, vector<64x128xbf16>
    %c3 = arith.constant 3 : index
    %c0_26 = arith.constant 0 : index
    %c0_27 = arith.constant 0 : index
    %48 = vector.load %arg3[%c3, %c0_26, %c0_27] : memref<7x2x512xf32, #tpu.memory_space<vmem>>, vector<1x2x512xf32>
    %49 = vector.shape_cast %48 : vector<1x2x512xf32> to vector<2x512xf32>
    %50 = vector.extract_strided_slice %49 {offsets = [0, 0], sizes = [1, 128], strides = [1, 1]} : vector<2x512xf32> to vector<1x128xf32>
    %51 = vector.extract_strided_slice %49 {offsets = [1, 0], sizes = [1, 128], strides = [1, 1]} : vector<2x512xf32> to vector<1x128xf32>
    %52 = arith.truncf %46 : vector<16x64xf32> to vector<16x64xbf16>
    %cst_28 = arith.constant dense<0.000000e+00> : vector<16x64xf32>
    %53 = tpu.matmul %0, %52, %cst_28 {dimension_numbers = #tpu.dot_dimension_numbers<[1], [0], [0], [1], [0, 0, 1, 1], [], []>} : vector<16x16xbf16>, vector<16x64xbf16>, vector<16x64xf32> -> vector<16x64xf32>
    %54 = arith.truncf %53 : vector<16x64xf32> to vector<16x64xbf16>
    %cst_29 = arith.constant dense<0.000000e+00> : vector<16x128xf32>
    %55 = tpu.matmul %54, %47, %cst_29 {dimension_numbers = #tpu.dot_dimension_numbers<[1], [0], [0], [1], [0, 0, 1, 1], [], []>} : vector<16x64xbf16>, vector<64x128xbf16>, vector<16x128xf32> -> vector<16x128xf32>
    %56 = vector.broadcast %50 : vector<1x128xf32> to vector<16x128xf32>
    %57 = arith.mulf %55, %56 : vector<16x128xf32>
    %58 = vector.broadcast %51 : vector<1x128xf32> to vector<16x128xf32>
    %59 = arith.addf %57, %58 : vector<16x128xf32>
    %cst_30 = arith.constant 0.000000e+00 : f32
    %60 = vector.broadcast %cst_30 : f32 to vector<16x128xf32>
    %61 = arith.maximumf %59, %60 : vector<16x128xf32>
    %c0_31 = arith.constant 0 : index
    %c0_32 = arith.constant 0 : index
    %62 = vector.load %arg8[%c0_31, %c0_32] : memref<128x256xbf16, #tpu.memory_space<vmem>>, vector<128x256xbf16>
    %c4 = arith.constant 4 : index
    %c0_33 = arith.constant 0 : index
    %c0_34 = arith.constant 0 : index
    %63 = vector.load %arg3[%c4, %c0_33, %c0_34] : memref<7x2x512xf32, #tpu.memory_space<vmem>>, vector<1x2x512xf32>
    %64 = vector.shape_cast %63 : vector<1x2x512xf32> to vector<2x512xf32>
    %65 = vector.extract_strided_slice %64 {offsets = [0, 0], sizes = [1, 256], strides = [1, 1]} : vector<2x512xf32> to vector<1x256xf32>
    %66 = vector.extract_strided_slice %64 {offsets = [1, 0], sizes = [1, 256], strides = [1, 1]} : vector<2x512xf32> to vector<1x256xf32>
    %67 = arith.truncf %61 : vector<16x128xf32> to vector<16x128xbf16>
    %cst_35 = arith.constant dense<0.000000e+00> : vector<16x128xf32>
    %68 = tpu.matmul %0, %67, %cst_35 {dimension_numbers = #tpu.dot_dimension_numbers<[1], [0], [0], [1], [0, 0, 1, 1], [], []>} : vector<16x16xbf16>, vector<16x128xbf16>, vector<16x128xf32> -> vector<16x128xf32>
    %69 = arith.truncf %68 : vector<16x128xf32> to vector<16x128xbf16>
    %cst_36 = arith.constant dense<0.000000e+00> : vector<16x256xf32>
    %70 = tpu.matmul %69, %62, %cst_36 {dimension_numbers = #tpu.dot_dimension_numbers<[1], [0], [0], [1], [0, 0, 1, 1], [], []>} : vector<16x128xbf16>, vector<128x256xbf16>, vector<16x256xf32> -> vector<16x256xf32>
    %71 = vector.broadcast %65 : vector<1x256xf32> to vector<16x256xf32>
    %72 = arith.mulf %70, %71 : vector<16x256xf32>
    %73 = vector.broadcast %66 : vector<1x256xf32> to vector<16x256xf32>
    %74 = arith.addf %72, %73 : vector<16x256xf32>
    %cst_37 = arith.constant 0.000000e+00 : f32
    %75 = vector.broadcast %cst_37 : f32 to vector<16x256xf32>
    %76 = arith.maximumf %74, %75 : vector<16x256xf32>
    %c0_38 = arith.constant 0 : index
    %c0_39 = arith.constant 0 : index
    %77 = vector.load %arg9[%c0_38, %c0_39] : memref<256x512xbf16, #tpu.memory_space<vmem>>, vector<256x512xbf16>
    %c5 = arith.constant 5 : index
    %c0_40 = arith.constant 0 : index
    %c0_41 = arith.constant 0 : index
    %78 = vector.load %arg3[%c5, %c0_40, %c0_41] : memref<7x2x512xf32, #tpu.memory_space<vmem>>, vector<1x2x512xf32>
    %79 = vector.shape_cast %78 : vector<1x2x512xf32> to vector<2x512xf32>
    %80 = vector.extract_strided_slice %79 {offsets = [0, 0], sizes = [1, 512], strides = [1, 1]} : vector<2x512xf32> to vector<1x512xf32>
    %81 = vector.extract_strided_slice %79 {offsets = [1, 0], sizes = [1, 512], strides = [1, 1]} : vector<2x512xf32> to vector<1x512xf32>
    %82 = arith.truncf %76 : vector<16x256xf32> to vector<16x256xbf16>
    %cst_42 = arith.constant dense<0.000000e+00> : vector<16x256xf32>
    %83 = tpu.matmul %0, %82, %cst_42 {dimension_numbers = #tpu.dot_dimension_numbers<[1], [0], [0], [1], [0, 0, 1, 1], [], []>} : vector<16x16xbf16>, vector<16x256xbf16>, vector<16x256xf32> -> vector<16x256xf32>
    %84 = arith.truncf %83 : vector<16x256xf32> to vector<16x256xbf16>
    %cst_43 = arith.constant dense<0.000000e+00> : vector<16x512xf32>
    %85 = tpu.matmul %84, %77, %cst_43 {dimension_numbers = #tpu.dot_dimension_numbers<[1], [0], [0], [1], [0, 0, 1, 1], [], []>} : vector<16x256xbf16>, vector<256x512xbf16>, vector<16x512xf32> -> vector<16x512xf32>
    %86 = vector.broadcast %80 : vector<1x512xf32> to vector<16x512xf32>
    %87 = arith.mulf %85, %86 : vector<16x512xf32>
    %88 = vector.broadcast %81 : vector<1x512xf32> to vector<16x512xf32>
    %89 = arith.addf %87, %88 : vector<16x512xf32>
    %cst_44 = arith.constant 0.000000e+00 : f32
    %90 = vector.broadcast %cst_44 : f32 to vector<16x512xf32>
    %91 = arith.maximumf %89, %90 : vector<16x512xf32>
    %c0_45 = arith.constant 0 : index
    %c0_46 = arith.constant 0 : index
    %92 = vector.load %arg10[%c0_45, %c0_46] : memref<512x8xbf16, #tpu.memory_space<vmem>>, vector<512x8xbf16>
    %c6 = arith.constant 6 : index
    %c0_47 = arith.constant 0 : index
    %c0_48 = arith.constant 0 : index
    %93 = vector.load %arg3[%c6, %c0_47, %c0_48] : memref<7x2x512xf32, #tpu.memory_space<vmem>>, vector<1x2x512xf32>
    %94 = vector.shape_cast %93 : vector<1x2x512xf32> to vector<2x512xf32>
    %95 = vector.extract_strided_slice %94 {offsets = [0, 0], sizes = [1, 8], strides = [1, 1]} : vector<2x512xf32> to vector<1x8xf32>
    %96 = vector.extract_strided_slice %94 {offsets = [1, 0], sizes = [1, 8], strides = [1, 1]} : vector<2x512xf32> to vector<1x8xf32>
    %97 = arith.truncf %91 : vector<16x512xf32> to vector<16x512xbf16>
    %cst_49 = arith.constant dense<0.000000e+00> : vector<16x8xf32>
    %98 = tpu.matmul %97, %92, %cst_49 {dimension_numbers = #tpu.dot_dimension_numbers<[1], [0], [0], [1], [0, 0, 1, 1], [], []>} : vector<16x512xbf16>, vector<512x8xbf16>, vector<16x8xf32> -> vector<16x8xf32>
    %99 = arith.truncf %98 : vector<16x8xf32> to vector<16x8xbf16>
    %cst_50 = arith.constant dense<0.000000e+00> : vector<16x8xf32>
    %100 = tpu.matmul %0, %99, %cst_50 {dimension_numbers = #tpu.dot_dimension_numbers<[1], [0], [0], [1], [0, 0, 1, 1], [], []>} : vector<16x16xbf16>, vector<16x8xbf16>, vector<16x8xf32> -> vector<16x8xf32>
    %101 = vector.broadcast %95 : vector<1x8xf32> to vector<16x8xf32>
    %102 = arith.mulf %100, %101 : vector<16x8xf32>
    %103 = vector.broadcast %96 : vector<1x8xf32> to vector<16x8xf32>
    %104 = arith.addf %102, %103 : vector<16x8xf32>
    %cst_51 = arith.constant dense<0xFF800000> : vector<16xf32>
    %105 = vector.multi_reduction <maximumf>, %104, %cst_51 [1] : vector<16x8xf32> to vector<16xf32>
    %106 = vector.shape_cast %105 : vector<16xf32> to vector<16x1xf32>
    %107 = vector.broadcast %106 : vector<16x1xf32> to vector<16x8xf32>
    %108 = arith.subf %104, %107 : vector<16x8xf32>
    %109 = math.exp %108 : vector<16x8xf32>
    %cst_52 = arith.constant dense<0.000000e+00> : vector<16xf32>
    %110 = vector.multi_reduction <add>, %109, %cst_52 [1] : vector<16x8xf32> to vector<16xf32>
    %111 = vector.shape_cast %110 : vector<16xf32> to vector<16x1xf32>
    %112 = math.log %111 : vector<16x1xf32>
    %113 = vector.broadcast %112 : vector<16x1xf32> to vector<16x8xf32>
    %114 = arith.subf %108, %113 : vector<16x8xf32>
    %c0_53 = arith.constant 0 : index
    %c0_54 = arith.constant 0 : index
    %115 = vector.load %arg11[%c0_53, %c0_54] : memref<16x8xf32, #tpu.memory_space<vmem>>, vector<16x8xf32>
    tpu.vector_store %arg11[%c0_53, %c0_54], %114 {strides = array<i32>} : memref<16x8xf32, #tpu.memory_space<vmem>>, vector<16x8xf32>,
    return
  }
  func.func @transform_0(%arg0: i32) -> (i32, i32) {
    %c0_i32 = arith.constant 0 : i32
    %c0_i32_0 = arith.constant 0 : i32
    %c0_i32_1 = arith.constant 0 : i32
    return %c0_i32, %c0_i32_0 : i32, i32
  }
  func.func @transform_1(%arg0: i32) -> (i32, i32) {
    %c0_i32 = arith.constant 0 : i32
    %c0_i32_0 = arith.constant 0 : i32
    %c0_i32_1 = arith.constant 0 : i32
    return %c0_i32, %c0_i32_0 : i32, i32
  }
  func.func @transform_2(%arg0: i32) -> (i32, i32, i32) {
    %c0_i32 = arith.constant 0 : i32
    %c0_i32_0 = arith.constant 0 : i32
    %c0_i32_1 = arith.constant 0 : i32
    %c0_i32_2 = arith.constant 0 : i32
    return %c0_i32, %c0_i32_0, %c0_i32_1 : i32, i32, i32
  }
  func.func @transform_3(%arg0: i32) -> (i32, i32) {
    %c0_i32 = arith.constant 0 : i32
    %c0_i32_0 = arith.constant 0 : i32
    %c0_i32_1 = arith.constant 0 : i32
    return %c0_i32, %c0_i32_0 : i32, i32
  }
  func.func @transform_4(%arg0: i32) -> (i32, i32) {
    %c0_i32 = arith.constant 0 : i32
    %c0_i32_0 = arith.constant 0 : i32
    %c0_i32_1 = arith.constant 0 : i32
    return %c0_i32, %c0_i32_0 : i32, i32
  }
  func.func @transform_5(%arg0: i32) -> (i32, i32) {
    %c0_i32 = arith.constant 0 : i32
    %c0_i32_0 = arith.constant 0 : i32
    %c0_i32_1 = arith.constant 0 : i32
    return %c0_i32, %c0_i32_0 : i32, i32
  }
  func.func @transform_6(%arg0: i32) -> (i32, i32) {
    %c0_i32 = arith.constant 0 : i32
    %c0_i32_0 = arith.constant 0 : i32
    %c0_i32_1 = arith.constant 0 : i32
    return %c0_i32, %c0_i32_0 : i32, i32
  }
  func.func @transform_7(%arg0: i32) -> (i32, i32) {
    %c0_i32 = arith.constant 0 : i32
    %c0_i32_0 = arith.constant 0 : i32
    %c0_i32_1 = arith.constant 0 : i32
    return %c0_i32, %c0_i32_0 : i32, i32
  }
  func.func @transform_8(%arg0: i32) -> (i32, i32) {
    %c0_i32 = arith.constant 0 : i32
    %c0_i32_0 = arith.constant 0 : i32
    %c0_i32_1 = arith.constant 0 : i32
    return %c0_i32, %c0_i32_0 : i32, i32
  }
  func.func @transform_9(%arg0: i32) -> (i32, i32) {
    %c0_i32 = arith.constant 0 : i32
    %c0_i32_0 = arith.constant 0 : i32
    %c0_i32_1 = arith.constant 0 : i32
    return %c0_i32, %c0_i32_0 : i32, i32
  }
  func.func @transform_10(%arg0: i32) -> (i32, i32) {
    %c0_i32 = arith.constant 0 : i32
    %c0_i32_0 = arith.constant 0 : i32
    %c0_i32_1 = arith.constant 0 : i32
    return %c0_i32, %c0_i32_0 : i32, i32
  }
}

</mosaic_0001>

<bundles_post_ra>
// kernel: tpu_custom_call.1
= control target key start
LH: loop header
LB: loop body
LE: loop exit
PB: predicated region body
PF: predicated region fallthrough
CT: control target
= control target key end

     0   :  { %15 = vsyncpa [#allocation3], 0  ;;  %s2288_s13 = smov [#allocation2]   ;;  %s2673_s0 = inlined_call_operand.vmem [shape: bf16[16,16], index: 0, kind: input, shape index: {}]   ;;  %s2674_s1 = inlined_call_operand.vmem [shape: f32[16,8], index: 1, kind: input, shape index: {}]   ;;  %s2675_s2 = inlined_call_operand.vmem [shape: f32[7,2,512], index: 2, kind: input, shape index: {}]   ;;  %s2676_s3 = inlined_call_operand.vmem [shape: bf16[8,16], index: 3, kind: input, shape index: {}]   ;;  %s2677_s4 = inlined_call_operand.vmem [shape: bf16[16,32], index: 4, kind: input, shape index: {}]   ;;  %s2678_s5 = inlined_call_operand.vmem [shape: bf16[32,64], index: 5, kind: input, shape index: {}]   ;;  %s2679_s6 = inlined_call_operand.vmem [shape: bf16[64,128], index: 6, kind: input, shape index: {}]   ;;  %s2680_s7 = inlined_call_operand.vmem [shape: bf16[128,256], index: 7, kind: input, shape index: {}]   ;;  %s2681_s8 = inlined_call_operand.hbm [shape: bf16[256,512], index: 8, kind: input, shape index: {}]   ;;  %s2682_s9 = inlined_call_operand.vmem [shape: bf16[512,8], index: 9, kind: input, shape index: {}]   ;;  %s2683_s10 = inlined_call_operand.vmem [shape: f32[16,8], index: 10, kind: output, shape index: {}]  }
   0x1   :  { %s37_s14 = sshll.u32 %s2288_s13, 4  ;;  %s2264_s17 = scalar_lea.hbm %s2681_s8, 8192  ;;  %s38_s14 = int_to_ptr.vmem [resolvable:$true] %s37_s14 }
   0x2   :  { %p2265_p0 = scmp.ne.s32.totalorder %s2681_s8, %s2264_s17  ;;  %p2268_p1 = scmp.lt.u32.totalorder %s2264_s17, %s2681_s8 }
   0x4   :  { %p2270_p2 = pnand %p2268_p1, %p2265_p0 }
   0x6   :  { %2273 = shalt.err (!%p2270_p2)
}
   0x7   :  { %s2274_s22 = scalar_lea.vmem %s38_s14, 8192  ;;  %p2279_p4 = scmp.lt.s32.totalorder %s38_s14, %s38_s14 }
   0x8   :  { %p2275_p3 = scmp.ne.s32.totalorder %s38_s14, %s2274_s22  ;;  %p2280_p5 = scmp.lt.s32.totalorder %s2274_s22, %s2274_s22 }
   0xa   :  { %p2281_p6 = por %p2280_p5, %p2279_p4 }
   0xc   :  { %p2282_p7 = pnand %p2281_p6, %p2275_p3 }
   0xe   :  { %2285 = shalt.err (!%p2282_p7)
}
   0xf   :  { %s2289_s23 = smov 256   ;;  %s2290_s24 = smov 16  }
  0x10   :  { %43 = dma.hbm_to_vmem [thread:$0]  %s2681_s8, 8192, %s38_s14, [#allocation3], %s2289_s23, %s2289_s23, %s2290_s24  }
  0x11   :  { %2286 = dma.done.wait [#allocation3], 8192  }
  0x12   :  { %2287 = vsyncadd [#allocation3], 4294959104  ;;  %v2291_v0 = vmov 0.0   ;;  %vm2292_vm0 = vmmov 0   ;;  %v52_v1 = vld [vmem:[%s2674_s1] sm:$0xff]  ;;  %v53_v2 = vld [vmem:[%s2674_s1 + $0x8] sm:$0xff]  ;;  %v157_v12 = vlaneseq }
  0x13   :  { %2021 = vmatprep.subr.bf16.mxu1 %v2291_v0  ;;  %2023 = vmatprep.mubr.msk.bf16.mxu1 %vm2292_vm0, %v2291_v0  ;;  %v56_v3 = vpack.c.bf16 %v53_v2, %v52_v1  ;;  %v2376_v4 = vld [vmem:[%s2673_s0] sm:$0xff]   ;;  %vm62_vm1 = vcmask 130048   ;;  %vm112_vm2 = vcmask 1043456   ;;  %vm108_vm3 = vcmask 64512   ;;  %v1819_v37 = vld [vmem:[%s2675_s2 + $0x8] sm:$0xff]  ;;  %v2101_v59 = vld [vmem:[%s2679_s6 + $0x10] sm:$0xff]  }
  0x14   :  { %2033 = vmatprep.subr.bf16.mxu0 %v2291_v0  ;;  %2035 = vmatprep.mubr.msk.bf16.mxu0 %vm2292_vm0, %v2291_v0  ;;  %v54_v5 = vld [vmem:[%s2676_s3] sm:$0xf]  ;;  %v2390_v13 = vshrl.u32 %v157_v12, 7  ;;  %v2098_v51 = vld [vmem:[%s2678_s5 + $0x8] sm:$0xff]   ;;  %vm343_vm4 = vcmask 261120   ;;  %v1823_v60 = vld [vmem:[%s2675_s2 + $0x10] sm:$0xff] }
  0x15   :  { %2022 = vmatpush3.bf16.msra.mxu1 %v56_v3  ;;  %v114_v6 = vsel %vm112_vm2, %v54_v5, 0  ;;  %v55_v15 = vld [vmem:[%s2675_s2] sm:$0xff]  ;;  %v2100_v58 = vld [vmem:[%s2679_s6 + $0x8] sm:$0xff]   ;;  %v2102_v12 = vld [vmem:[%s2679_s6 + $0x18] sm:$0xff]   ;;  %vm479_vm5 = vcmask 523264  }
  0x16   :  { %2027 = vmatprep.subr.bf16.mxu1 %v2291_v0  ;;  %v2393_v14 = vsub.s32 0, %v2390_v13  ;;  %v2399_v16 = vsub.s32 1, %v2390_v13  ;;  %v2096_v30 = vld [vmem:[%s2677_s4] sm:$0xff]  }
  0x17   :  { %v2097_v36 = vld [vmem:[%s2678_s5] sm:$0xff]  }
  0x18   :  { %2024 = vmatmul.mubr.msk.bf16.vlgmr.msra.gmra.mrb[0].mxu1 %vm62_vm1, %v2376_v4  ;;  %v160_v17 = vrot.slane %v55_v15, %v2393_v14  ;;  %v166_v18 = vrot.slane %v55_v15, %v2399_v16  ;;  %v271_v38 = vrot.slane %v1819_v37, %v2393_v14  ;;  %v277_v39 = vrot.slane %v1819_v37, %v2399_v16  ;;  %v2099_v57 = vld [vmem:[%s2679_s6] sm:$0xff]   ;;  %v2108_v37 = vld [vmem:[%s2680_s7 + $0x14] ss:$8 sps:$4 sm:$0xff]  }
  0x19   :  { %2029 = vmatprep.mubr.msk.bf16.mxu1 %vm2292_vm0, %v2291_v0  ;;  %2028 = vmatpush3.bf16.msra.mxu1 %v114_v6  ;;  %v391_v61 = vrot.slane %v1823_v60, %v2393_v14  ;;  %v397_v62 = vrot.slane %v1823_v60, %v2399_v16  ;;  %v2136_v60 = vld [vmem:[#allocation2 + $0x28] ss:$16 sps:$4 sm:$0xff]  }
  0x1a   :  { %2039 = vmatprep.subr.bf16.mxu1 %v2291_v0 }
  0xeb   :  { %v100_v7 = vpop.f32.mrb[0].mxu1 }
  0xec   :  { %v2025_v8 = vpop.f32.mrb[1].mxu1 }
  0xed   :  { %v103_v9 = vpop.f32.mrb[2].mxu1 }
  0xee   :  { %v107_v10 = vpack.c.bf16 %v103_v9, %v100_v7  ;;  %v2026_v11 = vpop.f32.mrb[3].mxu1 }
  0xf0   :  { %2030 = vmatmul.mubr.msk.bf16.vlgmr.msra.gmra.mrb[4].mxu1 %vm108_vm3, %v107_v10 }
  0xf1   :  { %2041 = vmatprep.mubr.msk.bf16.mxu1 %vm2292_vm0, %v2291_v0  ;;  %2040 = vmatpush3.bf16.msra.mxu1 %v2096_v30 }
  0xf2   :  { %2051 = vmatprep.subr.bf16.mxu1 %v2291_v0 }
 0x1c3   :  { %v150_v19 = vpop.f32.mrb[4].mxu1 }
 0x1c4   :  { %v161_v20 = vmul.f32 %v160_v17, %v150_v19  ;;  %v2031_v21 = vpop.f32.mrb[5].mxu1 }
 0x1c5   :  { %v153_v22 = vpop.f32.mrb[6].mxu1  ;;  %v1828_v21 = vld [vmem:[%s2675_s2 + $0x18] sm:$0xff] }
 0x1c6   :  { %v167_v23 = vadd.f32 %v166_v18, %v161_v20  ;;  %v162_v24 = vmul.f32 %v160_v17, %v153_v22  ;;  %v2032_v25 = vpop.f32.mrb[7].mxu1  ;;  %v527_v22 = vrot.slane %v1828_v21, %v2393_v14 }
 0x1c8   :  { %v168_v26 = vadd.f32 %v166_v18, %v162_v24  ;;  %v169_v27 = vmax.f32 %v167_v23, 0.0  ;;  %v533_v23 = vrot.slane %v1828_v21, %v2399_v16  ;;  %v2196_v21 = vld [vmem:[#allocation2 + $0x168] ss:$16 sps:$4 sm:$0xff]  }
 0x1ca   :  { %v170_v28 = vmax.f32 %v168_v26, 0.0 }
 0x1cc   :  { %v175_v29 = vpack.c.bf16 %v170_v28, %v169_v27 }
 0x1ce   :  { %2034 = vmatpush3.bf16.msra.mxu0 %v175_v29 }
 0x1cf   :  { %2045 = vmatprep.subr.bf16.mxu0 %v2291_v0 }
 0x1d1   :  { %2036 = vmatmul.mubr.msk.bf16.vlgmr.msra.gmra.mrb[0].mxu0 %vm62_vm1, %v2376_v4 }
 0x1d2   :  { %2047 = vmatprep.mubr.msk.bf16.mxu0 %vm2292_vm0, %v2291_v0 }
 0x2a4   :  { %v210_v31 = vpop.f32.mrb[0].mxu0 }
 0x2a5   :  { %v2037_v32 = vpop.f32.mrb[1].mxu0 }
 0x2a6   :  { %v213_v33 = vpop.f32.mrb[2].mxu0 }
 0x2a7   :  { %v217_v34 = vpack.c.bf16 %v213_v33, %v210_v31  ;;  %v2038_v35 = vpop.f32.mrb[3].mxu0 }
 0x2a9   :  { %2042 = vmatmul.mubr.msk.bf16.vlgmr.msra.gmra.mrb[8].mxu1 %vm62_vm1, %v217_v34  ;;  %v2105_v34 = vld [vmem:[%s2680_s7 + $0x4] ss:$8 sps:$4 sm:$0xff]  }
 0x2aa   :  { %2055 = vmatprep.mubr.msk.bf16.mxu1 %vm2292_vm0, %v2291_v0  ;;  %2052 = vmatpush3.bf16.msra.mxu1 %v2097_v36  ;;  %v2103_v36 = vld [vmem:[%s2680_s7] ss:$8 sps:$4 sm:$0xff]  }
 0x2ab   :  { %2053 = vmatprep.subr.bf16.mxu1 %v2291_v0 }
 0x2ae   :  { %2054 = vmatpush3.bf16.msra.mxu1 %v2098_v51  ;;  %v2293_v51 = vmov 0  }
 0x2af   :  { %2065 = vmatprep.subr.bf16.mxu1 %v2291_v0 }
 0x37c   :  { %v261_v40 = vpop.f32.mrb[8].mxu1 }
 0x37d   :  { %v272_v41 = vmul.f32 %v271_v38, %v261_v40  ;;  %v2043_v42 = vpop.f32.mrb[9].mxu1  ;;  %v2109_v40 = vld [vmem:[%s2680_s7 + $0x20] ss:$8 sps:$4 sm:$0xff]  }
 0x37e   :  { %v264_v43 = vpop.f32.mrb[10].mxu1  ;;  %v2112_v42 = vld [vmem:[%s2680_s7 + $0x30] ss:$8 sps:$4 sm:$0xff]  }
 0x37f   :  { %v278_v44 = vadd.f32 %v277_v39, %v272_v41  ;;  %v273_v45 = vmul.f32 %v271_v38, %v264_v43  ;;  %v2044_v46 = vpop.f32.mrb[11].mxu1  ;;  %v2106_v38 = vld [vmem:[%s2680_s7 + $0x10] ss:$8 sps:$4 sm:$0xff]   ;;  %v2114_v41 = vld [vmem:[%s2680_s7 + $0x34] ss:$8 sps:$4 sm:$0xff]  }
 0x380   :  { %v2117_v43 = vld [vmem:[%s2680_s7 + $0x44] ss:$8 sps:$4 sm:$0xff]   ;;  %v2118_v46 = vld [vmem:[%s2680_s7 + $0x50] ss:$8 sps:$4 sm:$0xff]  }
 0x381   :  { %v279_v47 = vadd.f32 %v277_v39, %v273_v45  ;;  %v280_v48 = vmax.f32 %v278_v44, 0.0  ;;  %v2111_v39 = vld [vmem:[%s2680_s7 + $0x24] ss:$8 sps:$4 sm:$0xff]   ;;  %v2115_v44 = vld [vmem:[%s2680_s7 + $0x40] ss:$8 sps:$4 sm:$0xff]  }
 0x382   :  { %v2120_v45 = vld [vmem:[%s2680_s7 + $0x54] ss:$8 sps:$4 sm:$0xff]  }
 0x383   :  { %v281_v49 = vmax.f32 %v279_v47, 0.0  ;;  %v2123_v47 = vld [vmem:[%s2680_s7 + $0x64] ss:$8 sps:$4 sm:$0xff]  }
 0x385   :  { %v288_v50 = vpack.c.bf16 %v281_v49, %v280_v48  ;;  %v2121_v48 = vld [vmem:[%s2680_s7 + $0x60] ss:$8 sps:$4 sm:$0xff]   ;;  %v2126_v49 = vld [vmem:[%s2680_s7 + $0x74] ss:$8 sps:$4 sm:$0xff]  }
 0x387   :  { %2046 = vmatpush3.bf16.msra.mxu0 %v288_v50  ;;  %v2124_v50 = vld [vmem:[%s2680_s7 + $0x70] ss:$8 sps:$4 sm:$0xff]  }
 0x388   :  { %2059 = vmatprep.subr.bf16.mxu0 %v2291_v0 }
 0x38a   :  { %2048 = vmatmul.mubr.msk.bf16.vlgmr.msra.gmra.mrb[4].mxu0 %vm62_vm1, %v2376_v4 }
 0x38b   :  { %2061 = vmatprep.mubr.msk.bf16.mxu0 %vm2292_vm0, %v2291_v0 }
 0x45d   :  { %v323_v52 = vpop.f32.mrb[4].mxu0 }
 0x45e   :  { %v2049_v53 = vpop.f32.mrb[5].mxu0 }
 0x45f   :  { %v326_v54 = vpop.f32.mrb[6].mxu0 }
 0x460   :  { %v330_v55 = vpack.c.bf16 %v326_v54, %v323_v52  ;;  %v2050_v56 = vpop.f32.mrb[7].mxu0 }
 0x462   :  { %2056 = vmatmul.mubr.msk.bf16.vlgmr.msra.gmra.mrb[12].mxu1 %vm343_vm4, %v330_v55 }
 0x463   :  { %2073 = vmatprep.mubr.msk.bf16.mxu1 %vm2292_vm0, %v2291_v0  ;;  %2066 = vmatpush3.bf16.msra.mxu1 %v2099_v57  ;;  %v2130_v57 = vld [vmem:[#allocation2 + $0x8] ss:$16 sps:$4 sm:$0xff]  }
 0x464   :  { %2067 = vmatprep.subr.bf16.mxu1 %v2291_v0 }
 0x467   :  { %2068 = vmatpush3.bf16.msra.mxu1 %v2100_v58  ;;  %v2132_v58 = vld [vmem:[#allocation2 + $0xc] ss:$16 sps:$4 sm:$0xff]  }
 0x468   :  { %2069 = vmatprep.subr.bf16.mxu1 %v2291_v0 }
 0x46b   :  { %2070 = vmatpush3.bf16.msra.mxu1 %v2101_v59  ;;  %v2138_v59 = vld [vmem:[#allocation2 + $0x2c] ss:$16 sps:$4 sm:$0xff]  }
 0x46c   :  { %2071 = vmatprep.subr.bf16.mxu1 %v2291_v0 }
 0x46f   :  { %2072 = vmatpush3.bf16.msra.mxu1 %v2102_v12  ;;  %v2178_v12 = vld [vmem:[#allocation2 + $0x108] ss:$16 sps:$4 sm:$0xff]  }
 0x535   :  { %v381_v63 = vpop.f32.mrb[12].mxu1 }
 0x536   :  { %v392_v1 = vmul.f32 %v391_v61, %v381_v63  ;;  %v2057_v2 = vpop.f32.mrb[13].mxu1  ;;  %v2150_v63 = vld [vmem:[#allocation2 + $0x6c] ss:$16 sps:$4 sm:$0xff]  }
 0x537   :  { %v384_v3 = vpop.f32.mrb[14].mxu1  ;;  %v2156_v2 = vld [vmem:[#allocation2 + $0x8c] ss:$16 sps:$4 sm:$0xff]  }
 0x538   :  { %v398_v5 = vadd.f32 %v397_v62, %v392_v1  ;;  %v393_v6 = vmul.f32 %v391_v61, %v384_v3  ;;  %v2058_v7 = vpop.f32.mrb[15].mxu1  ;;  %v2144_v61 = vld [vmem:[#allocation2 + $0x4c] ss:$16 sps:$4 sm:$0xff]   ;;  %v2148_v1 = vld [vmem:[#allocation2 + $0x68] ss:$16 sps:$4 sm:$0xff]  }
 0x539   :  { %v2154_v3 = vld [vmem:[#allocation2 + $0x88] ss:$16 sps:$4 sm:$0xff]   ;;  %v2168_v7 = vld [vmem:[#allocation2 + $0xcc] ss:$16 sps:$4 sm:$0xff]  }
 0x53a   :  { %v399_v8 = vadd.f32 %v397_v62, %v393_v6  ;;  %v400_v9 = vmax.f32 %v398_v5, 0.0  ;;  %v2142_v62 = vld [vmem:[#allocation2 + $0x48] ss:$16 sps:$4 sm:$0xff]   ;;  %v2162_v5 = vld [vmem:[#allocation2 + $0xac] ss:$16 sps:$4 sm:$0xff]  }
 0x53b   :  { %v2160_v6 = vld [vmem:[#allocation2 + $0xa8] ss:$16 sps:$4 sm:$0xff]  }
 0x53c   :  { %v401_v10 = vmax.f32 %v399_v8, 0.0  ;;  %v2166_v8 = vld [vmem:[#allocation2 + $0xc8] ss:$16 sps:$4 sm:$0xff]  }
 0x53e   :  { %v412_v11 = vpack.c.bf16 %v401_v10, %v400_v9  ;;  %v2174_v9 = vld [vmem:[#allocation2 + $0xec] ss:$16 sps:$4 sm:$0xff]   ;;  %v2172_v10 = vld [vmem:[#allocation2 + $0xe8] ss:$16 sps:$4 sm:$0xff]  }
 0x540   :  { %2060 = vmatpush3.bf16.msra.mxu0 %v412_v11  ;;  %v2180_v11 = vld [vmem:[#allocation2 + $0x10c] ss:$16 sps:$4 sm:$0xff]  }
 0x541   :  { %2077 = vmatprep.subr.bf16.mxu0 %v2291_v0 }
 0x543   :  { %2062 = vmatmul.mubr.msk.bf16.vlgmr.msra.gmra.mrb[8].mxu0 %vm62_vm1, %v2376_v4 }
 0x544   :  { %2079 = vmatprep.mubr.msk.bf16.mxu0 %vm2292_vm0, %v2291_v0 }
 0x616   :  { %v447_v15 = vpop.f32.mrb[8].mxu0 }
 0x617   :  { %v2063_v17 = vpop.f32.mrb[9].mxu0 }
 0x618   :  { %v450_v18 = vpop.f32.mrb[10].mxu0  ;;  %v2184_v17 = vld [vmem:[#allocation2 + $0x128] ss:$16 sps:$4 sm:$0xff]  }
 0x619   :  { %v454_v19 = vpack.c.bf16 %v450_v18, %v447_v15  ;;  %v2064_v20 = vpop.f32.mrb[11].mxu0  ;;  %v2186_v15 = vld [vmem:[#allocation2 + $0x12c] ss:$16 sps:$4 sm:$0xff]  }
 0x61a   :  { %v2192_v18 = vld [vmem:[#allocation2 + $0x14c] ss:$16 sps:$4 sm:$0xff]  }
 0x61b   :  { %2074 = vmatmul.mubr.msk.bf16.vlgmr.msra.gmra.mrb[16].mxu1 %vm479_vm5, %v454_v19  ;;  %v2190_v19 = vld [vmem:[#allocation2 + $0x148] ss:$16 sps:$4 sm:$0xff]   ;;  %v2198_v20 = vld [vmem:[#allocation2 + $0x16c] ss:$16 sps:$4 sm:$0xff]  }
 0x61c   :  { %871 = vmatprep.mubr.bf16.mxu1 %v2293_v51 }
 0x6ee   :  { %v517_v24 = vpop.f32.mrb[16].mxu1 }
 0x6ef   :  { %v528_v25 = vmul.f32 %v527_v22, %v517_v24  ;;  %v2075_v26 = vpop.f32.mrb[17].mxu1  ;;  %v2210_v24 = vld [vmem:[#allocation2 + $0x1ac] ss:$16 sps:$4 sm:$0xff]  }
 0x6f0   :  { %v520_v27 = vpop.f32.mrb[18].mxu1  ;;  %v2216_v26 = vld [vmem:[#allocation2 + $0x1cc] ss:$16 sps:$4 sm:$0xff]  }
 0x6f1   :  { %v534_v28 = vadd.f32 %v533_v23, %v528_v25  ;;  %v529_v29 = vmul.f32 %v527_v22, %v520_v27  ;;  %v2076_v30 = vpop.f32.mrb[19].mxu1  ;;  %v2204_v22 = vld [vmem:[#allocation2 + $0x18c] ss:$16 sps:$4 sm:$0xff]   ;;  %v2208_v25 = vld [vmem:[#allocation2 + $0x1a8] ss:$16 sps:$4 sm:$0xff]  }
 0x6f2   :  { %v2214_v27 = vld [vmem:[#allocation2 + $0x1c8] ss:$16 sps:$4 sm:$0xff]   ;;  %v751_v30 = vsub.s32 3, %v2390_v13 }
 0x6f3   :  { %v535_v31 = vadd.f32 %v533_v23, %v529_v29  ;;  %v536_v32 = vmax.f32 %v534_v28, 0.0  ;;  %v2202_v23 = vld [vmem:[#allocation2 + $0x188] ss:$16 sps:$4 sm:$0xff]   ;;  %v1835_v28 = vld [vmem:[%s2675_s2 + $0x20] sm:$0xff]  ;;  %v729_v29 = vsub.s32 2, %v2390_v13 }
 0x6f5   :  { %v537_v33 = vmax.f32 %v535_v31, 0.0  ;;  %v726_v31 = vrot.slane %v1835_v28, %v2393_v14 }
 0x6f7   :  { %v556_v35 = vpack.c.bf16 %v537_v33, %v536_v32  ;;  %v730_v32 = vrot.slane %v1835_v28, %v729_v29  ;;  %v748_v33 = vrot.slane %v1835_v28, %v2399_v16 }
 0x6f9   :  { %2078 = vmatpush3.bf16.msra.mxu0 %v556_v35  ;;  %v736_v35 = vrot.slane %v726_v31, %v2393_v14  ;;  %v2217_v31 = vld [vmem:[#allocation2 + $0x1e0] ss:$16 sps:$4 sm:$0xff]  }
 0x6fa   :  { %679 = vmatprep.subr.bf16.mxu0 %v2105_v34  ;;  %v752_v34 = vrot.slane %v1835_v28, %v751_v30  ;;  %v2222_v28 = vld [vmem:[#allocation2 + $0x1ec] ss:$16 sps:$4 sm:$0xff]  }
 0x6fc   :  { %2080 = vmatmul.mubr.msk.bf16.vlgmr.msra.gmra.mrb[12].mxu0 %vm62_vm1, %v2376_v4 }
 0x6fd   :  { %680 = vmatpush1.bf16.msra.mxu0 %v2103_v36  ;;  %711 = vmatprep.mubr.bf16.mxu0 %v2293_v51  ;;  %v740_v36 = vrot.slane %v730_v32, %v2393_v14  ;;  %v2220_v32 = vld [vmem:[#allocation2 + $0x1e8] ss:$16 sps:$4 sm:$0xff]  }
 0x6fe   :  { %681 = vmatprep.subr.bf16.mxu0 %v2108_v37  ;;  %v758_v37 = vrot.slane %v748_v33, %v2399_v16  ;;  %v2223_v33 = vld [vmem:[%s2682_s9 + $0x40] sm:$0xff]  }
 0x701   :  { %682 = vmatpush1.bf16.msra.mxu0 %v2106_v38 }
 0x702   :  { %683 = vmatprep.subr.bf16.mxu0 %v2111_v39  ;;  %v762_v39 = vrot.slane %v752_v34, %v2399_v16  ;;  %v2224_v34 = vld [vmem:[%s2682_s9 + $0xc0] sm:$0xff]  }
 0x705   :  { %684 = vmatpush1.bf16.msra.mxu0 %v2109_v40 }
 0x706   :  { %685 = vmatprep.subr.bf16.mxu0 %v2114_v41 }
 0x709   :  { %686 = vmatpush1.bf16.msra.mxu0 %v2112_v42 }
 0x70a   :  { %687 = vmatprep.subr.bf16.mxu0 %v2117_v43 }
 0x70d   :  { %688 = vmatpush1.bf16.msra.mxu0 %v2115_v44 }
 0x70e   :  { %689 = vmatprep.subr.bf16.mxu0 %v2120_v45 }
 0x711   :  { %690 = vmatpush1.bf16.msra.mxu0 %v2118_v46 }
 0x712   :  { %691 = vmatprep.subr.bf16.mxu0 %v2123_v47 }
 0x715   :  { %692 = vmatpush1.bf16.msra.mxu0 %v2121_v48 }
 0x716   :  { %693 = vmatprep.subr.bf16.mxu0 %v2126_v49 }
 0x719   :  { %694 = vmatpush1.bf16.msra.mxu0 %v2124_v50 }
 0x71a   :  { %1247 = vmatprep.subr.bf16.mxu0 %v2132_v58  ;;  %v2127_v58 = vld [vmem:[#allocation2] ss:$16 sps:$4 sm:$0xff]  }
 0x7cf   :  { %v591_v52 = vpop.f32.mrb[12].mxu0 }
 0x7d0   :  { %v2081_v53 = vpop.f32.mrb[13].mxu0 }
 0x7d1   :  { %v594_v54 = vpop.f32.mrb[14].mxu0 }
 0x7d2   :  { %v598_v55 = vpack.c.bf16 %v594_v54, %v591_v52  ;;  %v2082_v56 = vpop.f32.mrb[15].mxu0 }
 0x7d4   :  { %712 = vmatmul.mubr.bf16.vlgmr.msra.gmra.mrb[16].mxu0 %v598_v55 }
 0x7d5   :  { %1248 = vmatpush1.bf16.msra.mxu0 %v2130_v57  ;;  %v2129_v57 = vld [vmem:[#allocation2 + $0x4] ss:$16 sps:$4 sm:$0xff]  }
 0x7d6   :  { %1249 = vmatprep.subr.bf16.mxu0 %v2138_v59  ;;  %v2135_v59 = vld [vmem:[#allocation2 + $0x24] ss:$16 sps:$4 sm:$0xff]  }
 0x7d9   :  { %1250 = vmatpush1.bf16.msra.mxu0 %v2136_v60  ;;  %v2133_v60 = vld [vmem:[#allocation2 + $0x20] ss:$16 sps:$4 sm:$0xff]  }
 0x7da   :  { %1251 = vmatprep.subr.bf16.mxu0 %v2144_v61  ;;  %v2141_v61 = vld [vmem:[#allocation2 + $0x44] ss:$16 sps:$4 sm:$0xff]  }
 0x7dd   :  { %1252 = vmatpush1.bf16.msra.mxu0 %v2142_v62  ;;  %v2139_v62 = vld [vmem:[#allocation2 + $0x40] ss:$16 sps:$4 sm:$0xff]  }
 0x7de   :  { %1253 = vmatprep.subr.bf16.mxu0 %v2150_v63  ;;  %v2147_v63 = vld [vmem:[#allocation2 + $0x64] ss:$16 sps:$4 sm:$0xff]  }
 0x7e1   :  { %1254 = vmatpush1.bf16.msra.mxu0 %v2148_v1  ;;  %v2145_v1 = vld [vmem:[#allocation2 + $0x60] ss:$16 sps:$4 sm:$0xff]  }
 0x7e2   :  { %1255 = vmatprep.subr.bf16.mxu0 %v2156_v2  ;;  %v2153_v2 = vld [vmem:[#allocation2 + $0x84] ss:$16 sps:$4 sm:$0xff]  }
 0x7e5   :  { %1256 = vmatpush1.bf16.msra.mxu0 %v2154_v3  ;;  %v2151_v3 = vld [vmem:[#allocation2 + $0x80] ss:$16 sps:$4 sm:$0xff]  }
 0x7e6   :  { %1257 = vmatprep.subr.bf16.mxu0 %v2162_v5  ;;  %v2159_v5 = vld [vmem:[#allocation2 + $0xa4] ss:$16 sps:$4 sm:$0xff]  }
 0x7e9   :  { %1258 = vmatpush1.bf16.msra.mxu0 %v2160_v6  ;;  %v2157_v6 = vld [vmem:[#allocation2 + $0xa0] ss:$16 sps:$4 sm:$0xff]  }
 0x7ea   :  { %1259 = vmatprep.subr.bf16.mxu0 %v2168_v7  ;;  %v2163_v7 = vld [vmem:[#allocation2 + $0xc0] ss:$16 sps:$4 sm:$0xff]  }
 0x7ed   :  { %1260 = vmatpush1.bf16.msra.mxu0 %v2166_v8  ;;  %v2171_v8 = vld [vmem:[#allocation2 + $0xe4] ss:$16 sps:$4 sm:$0xff]  }
 0x7ee   :  { %1261 = vmatprep.subr.bf16.mxu0 %v2174_v9  ;;  %v2169_v9 = vld [vmem:[#allocation2 + $0xe0] ss:$16 sps:$4 sm:$0xff]  }
 0x7f1   :  { %1262 = vmatpush1.bf16.msra.mxu0 %v2172_v10  ;;  %v2177_v10 = vld [vmem:[#allocation2 + $0x104] ss:$16 sps:$4 sm:$0xff]  }
 0x7f2   :  { %1263 = vmatprep.subr.bf16.mxu0 %v2180_v11  ;;  %v2175_v11 = vld [vmem:[#allocation2 + $0x100] ss:$16 sps:$4 sm:$0xff]  }
 0x7f5   :  { %1264 = vmatpush1.bf16.msra.mxu0 %v2178_v12  ;;  %v2183_v12 = vld [vmem:[#allocation2 + $0x124] ss:$16 sps:$4 sm:$0xff]  }
 0x7f6   :  { %1265 = vmatprep.subr.bf16.mxu0 %v2186_v15  ;;  %v2181_v15 = vld [vmem:[#allocation2 + $0x120] ss:$16 sps:$4 sm:$0xff]  }
 0x7f9   :  { %1266 = vmatpush1.bf16.msra.mxu0 %v2184_v17  ;;  %v2189_v17 = vld [vmem:[#allocation2 + $0x144] ss:$16 sps:$4 sm:$0xff]  }
 0x7fa   :  { %1267 = vmatprep.subr.bf16.mxu0 %v2192_v18  ;;  %v2187_v18 = vld [vmem:[#allocation2 + $0x140] ss:$16 sps:$4 sm:$0xff]  }
 0x7fd   :  { %1268 = vmatpush1.bf16.msra.mxu0 %v2190_v19  ;;  %v2195_v19 = vld [vmem:[#allocation2 + $0x164] ss:$16 sps:$4 sm:$0xff]  }
 0x7fe   :  { %1269 = vmatprep.subr.bf16.mxu0 %v2198_v20  ;;  %v2193_v20 = vld [vmem:[#allocation2 + $0x160] ss:$16 sps:$4 sm:$0xff]  }
 0x801   :  { %1270 = vmatpush1.bf16.msra.mxu0 %v2196_v21  ;;  %v2201_v21 = vld [vmem:[#allocation2 + $0x184] ss:$16 sps:$4 sm:$0xff]  }
 0x802   :  { %1271 = vmatprep.subr.bf16.mxu0 %v2204_v22  ;;  %v2199_v22 = vld [vmem:[#allocation2 + $0x180] ss:$16 sps:$4 sm:$0xff]  }
 0x805   :  { %1272 = vmatpush1.bf16.msra.mxu0 %v2202_v23  ;;  %v2207_v23 = vld [vmem:[#allocation2 + $0x1a4] ss:$16 sps:$4 sm:$0xff]  }
 0x806   :  { %1273 = vmatprep.subr.bf16.mxu0 %v2210_v24  ;;  %v2205_v24 = vld [vmem:[#allocation2 + $0x1a0] ss:$16 sps:$4 sm:$0xff]  }
 0x809   :  { %1274 = vmatpush1.bf16.msra.mxu0 %v2208_v25  ;;  %v2213_v25 = vld [vmem:[#allocation2 + $0x1c4] ss:$16 sps:$4 sm:$0xff]  }
 0x80a   :  { %1275 = vmatprep.subr.bf16.mxu0 %v2216_v26  ;;  %v2211_v26 = vld [vmem:[#allocation2 + $0x1c0] ss:$16 sps:$4 sm:$0xff]  }
 0x80d   :  { %1276 = vmatpush1.bf16.msra.mxu0 %v2214_v27  ;;  %v2219_v27 = vld [vmem:[#allocation2 + $0x1e4] ss:$16 sps:$4 sm:$0xff]  }
 0x80e   :  { %1277 = vmatprep.subr.bf16.mxu0 %v2222_v28 }
 0x811   :  { %1278 = vmatpush1.bf16.msra.mxu0 %v2220_v32 }
 0x812   :  { %1997 = vmatprep.subr.bf16.mxu0 %v2224_v34 }
 0x8a7   :  { %v713_v38 = vpop.f32.mrb[16].mxu0 }
 0x8a8   :  { %v741_v40 = vmul.f32 %v736_v35, %v713_v38  ;;  %v715_v41 = vpop.f32.mrb[17].mxu0 }
 0x8a9   :  { %v742_v42 = vmul.f32 %v740_v36, %v715_v41  ;;  %v717_v43 = vpop.f32.mrb[18].mxu0  ;;  %v2225_v41 = vld [vmem:[%s2682_s9] sm:$0xff]  }
 0x8aa   :  { %v763_v44 = vadd.f32 %v758_v37, %v741_v40  ;;  %v743_v45 = vmul.f32 %v736_v35, %v717_v43  ;;  %v719_v46 = vpop.f32.mrb[19].mxu0  ;;  %v2227_v43 = vld [vmem:[%s2682_s9 + $0x48] sm:$0xff]  }
 0x8ab   :  { %v764_v47 = vadd.f32 %v762_v39, %v742_v42  ;;  %v744_v48 = vmul.f32 %v740_v36, %v719_v46  ;;  %v2226_v42 = vld [vmem:[%s2682_s9 + $0x80] sm:$0xff]   ;;  %v2230_v46 = vld [vmem:[%s2682_s9 + $0x88] sm:$0xff]  }
 0x8ac   :  { %v765_v49 = vadd.f32 %v758_v37, %v743_v45  ;;  %v767_v51 = vmax.f32 %v763_v44, 0.0  ;;  %v2228_v44 = vld [vmem:[%s2682_s9 + $0xc8] sm:$0xff]  }
 0x8ad   :  { %v766_v50 = vadd.f32 %v762_v39, %v744_v48  ;;  %v768_v53 = vmax.f32 %v764_v47, 0.0  ;;  %v2229_v45 = vld [vmem:[%s2682_s9 + $0x8] sm:$0xff]   ;;  %v2231_v47 = vld [vmem:[%s2682_s9 + $0x50] sm:$0xff]  }
 0x8ae   :  { %v769_v52 = vmax.f32 %v765_v49, 0.0  ;;  %v2232_v48 = vld [vmem:[%s2682_s9 + $0xd0] sm:$0xff]  }
 0x8af   :  { %v770_v54 = vmax.f32 %v766_v50, 0.0  ;;  %v2233_v49 = vld [vmem:[%s2682_s9 + $0x10] sm:$0xff]  }
 0x8b0   :  { %v837_v55 = vpack.c.bf16 %v769_v52, %v767_v51  ;;  %v2234_v50 = vld [vmem:[%s2682_s9 + $0x90] sm:$0xff]   ;;  %v2235_v51 = vld [vmem:[%s2682_s9 + $0x58] sm:$0xff]  }
 0x8b1   :  { %v838_v56 = vpack.c.bf16 %v770_v54, %v768_v53  ;;  %v2236_v52 = vld [vmem:[%s2682_s9 + $0xd8] sm:$0xff]  }
 0x8b2   :  { %v2237_v53 = vld [vmem:[%s2682_s9 + $0x18] sm:$0xff]  }
 0x8b3   :  { %839 = vmatprep.subr.bf16.mxu1 %v838_v56  ;;  %v2238_v54 = vld [vmem:[%s2682_s9 + $0x98] sm:$0xff]   ;;  %v2240_v56 = vld [vmem:[%s2682_s9 + $0xe0] sm:$0xff]  }
 0x8b4   :  { %840 = vmatpush1.bf16.msra.mxu1 %v837_v55  ;;  %v2239_v55 = vld [vmem:[%s2682_s9 + $0x60] sm:$0xff]  }
 0x8b5   :  { %1204 = vmatprep.subr.bf16.mxu1 %v2129_v57  ;;  %v2241_v57 = vld [vmem:[%s2682_s9 + $0x20] sm:$0xff]  }
 0x8b7   :  { %1854 = vmatmul.mubr.msk.bf16.vlgmr.msra.gmra.mrb[20].mxu1 %vm62_vm1, %v2376_v4  ;;  %v2165_v4 = vld [vmem:[#allocation2 + $0xc4] ss:$16 sps:$4 sm:$0xff]  }
 0x8b8   :  { %1205 = vmatpush1.bf16.msra.mxu1 %v2127_v58  ;;  %v2242_v58 = vld [vmem:[%s2682_s9 + $0xa0] sm:$0xff]  }
 0x8b9   :  { %1206 = vmatprep.subr.bf16.mxu1 %v2135_v59  ;;  %v2243_v59 = vld [vmem:[%s2682_s9 + $0x68] sm:$0xff]  }
 0x8bc   :  { %1207 = vmatpush1.bf16.msra.mxu1 %v2133_v60  ;;  %v2244_v60 = vld [vmem:[%s2682_s9 + $0xe8] sm:$0xff]  }
 0x8bd   :  { %1208 = vmatprep.subr.bf16.mxu1 %v2141_v61  ;;  %v2245_v61 = vld [vmem:[%s2682_s9 + $0x28] sm:$0xff]  }
 0x8c0   :  { %1209 = vmatpush1.bf16.msra.mxu1 %v2139_v62  ;;  %v2246_v62 = vld [vmem:[%s2682_s9 + $0xa8] sm:$0xff]  }
 0x8c1   :  { %1210 = vmatprep.subr.bf16.mxu1 %v2147_v63  ;;  %v2247_v63 = vld [vmem:[%s2682_s9 + $0x70] sm:$0xff]  }
 0x8c4   :  { %1211 = vmatpush1.bf16.msra.mxu1 %v2145_v1  ;;  %v2248_v1 = vld [vmem:[%s2682_s9 + $0xf0] sm:$0xff]  }
 0x8c5   :  { %1212 = vmatprep.subr.bf16.mxu1 %v2153_v2  ;;  %v2249_v2 = vld [vmem:[%s2682_s9 + $0x30] sm:$0xff]  }
 0x8c8   :  { %1213 = vmatpush1.bf16.msra.mxu1 %v2151_v3  ;;  %v2250_v3 = vld [vmem:[%s2682_s9 + $0xb0] sm:$0xff]  }
 0x8c9   :  { %1214 = vmatprep.subr.bf16.mxu1 %v2159_v5  ;;  %v2251_v5 = vld [vmem:[%s2682_s9 + $0x78] sm:$0xff]  }
 0x8cc   :  { %1215 = vmatpush1.bf16.msra.mxu1 %v2157_v6  ;;  %v2252_v6 = vld [vmem:[%s2682_s9 + $0xf8] sm:$0xff]  }
 0x8cd   :  { %1216 = vmatprep.subr.bf16.mxu1 %v2165_v4  ;;  %v2253_v4 = vld [vmem:[%s2682_s9 + $0x38] sm:$0xff]  }
 0x8d0   :  { %1217 = vmatpush1.bf16.msra.mxu1 %v2163_v7  ;;  %v2254_v7 = vld [vmem:[%s2682_s9 + $0xb8] sm:$0xff]  }
 0x8d1   :  { %1218 = vmatprep.subr.bf16.mxu1 %v2171_v8  ;;  %v1301_v8 = vsub.s32 4, %v2390_v13 }
 0x8d4   :  { %1219 = vmatpush1.bf16.msra.mxu1 %v2169_v9  ;;  %v1853_v9 = vld [vmem:[%s2675_s2 + $0x28] sm:$0xff] }
 0x8d5   :  { %1220 = vmatprep.subr.bf16.mxu1 %v2177_v10  ;;  %v1305_v10 = vsub.s32 6, %v2390_v13 }
 0x8d8   :  { %1221 = vmatpush1.bf16.msra.mxu1 %v2175_v11  ;;  %v1345_v11 = vsub.s32 5, %v2390_v13 }
 0x8d9   :  { %1222 = vmatprep.subr.bf16.mxu1 %v2183_v12  ;;  %v1349_v12 = vsub.s32 7, %v2390_v13 }
 0x8dc   :  { %1223 = vmatpush1.bf16.msra.mxu1 %v2181_v15  ;;  %v1294_v15 = vrot.slane %v1853_v9, %v2393_v14 }
 0x8dd   :  { %1224 = vmatprep.subr.bf16.mxu1 %v2189_v17  ;;  %v1302_v17 = vrot.slane %v1853_v9, %v1301_v8 }
 0x8e0   :  { %1225 = vmatpush1.bf16.msra.mxu1 %v2187_v18  ;;  %v1298_v18 = vrot.slane %v1853_v9, %v729_v29 }
 0x8e1   :  { %1226 = vmatprep.subr.bf16.mxu1 %v2195_v19  ;;  %v1306_v19 = vrot.slane %v1853_v9, %v1305_v10 }
 0x8e4   :  { %1227 = vmatpush1.bf16.msra.mxu1 %v2193_v20  ;;  %v1338_v20 = vrot.slane %v1853_v9, %v2399_v16 }
 0x8e5   :  { %1228 = vmatprep.subr.bf16.mxu1 %v2201_v21  ;;  %v1346_v21 = vrot.slane %v1853_v9, %v1345_v11 }
 0x8e6   :  { %v1358_v28 = vrot.slane %v1338_v20, %v2399_v16 }
 0x8e7   :  { %v1366_v29 = vrot.slane %v1346_v21, %v2399_v16 }
 0x8e8   :  { %1229 = vmatpush1.bf16.msra.mxu1 %v2199_v22  ;;  %v1342_v22 = vrot.slane %v1853_v9, %v751_v30 }
 0x8e9   :  { %1230 = vmatprep.subr.bf16.mxu1 %v2207_v23  ;;  %v1350_v23 = vrot.slane %v1853_v9, %v1349_v12 }
 0x8eb   :  { %v1370_v13 = vrot.slane %v1350_v23, %v2399_v16 }
 0x8ec   :  { %1231 = vmatpush1.bf16.msra.mxu1 %v2205_v24  ;;  %v1314_v24 = vrot.slane %v1294_v15, %v2393_v14 }
 0x8ed   :  { %1232 = vmatprep.subr.bf16.mxu1 %v2213_v25  ;;  %v1322_v25 = vrot.slane %v1302_v17, %v2393_v14 }
 0x8f0   :  { %1233 = vmatpush1.bf16.msra.mxu1 %v2211_v26  ;;  %v1318_v26 = vrot.slane %v1298_v18, %v2393_v14 }
 0x8f1   :  { %1234 = vmatprep.subr.bf16.mxu1 %v2219_v27  ;;  %v1326_v27 = vrot.slane %v1306_v19, %v2393_v14 }
 0x8f4   :  { %1235 = vmatpush1.bf16.msra.mxu1 %v2217_v31 }
 0x8f5   :  { %1975 = vmatprep.subr.bf16.mxu1 %v2223_v33  ;;  %v1362_v33 = vrot.slane %v1342_v22, %v2399_v16  ;;  %v1919_v22 = vld [vmem:[%s2675_s2 + $0x30] sm:$0xff] }
 0x8f6   :  { %v1776_v23 = vrot.slane %v1919_v22, %v2393_v14 }
 0x98a   :  { %v873_v35 = vpop.f32.mrb[20].mxu1 }
 0x98b   :  { %v875_v36 = vpop.f32.mrb[21].mxu1 }
 0x98c   :  { %v877_v37 = vpop.f32.mrb[22].mxu1 }
 0x98d   :  { %v882_v38 = vpack.c.bf16 %v877_v37, %v873_v35  ;;  %v879_v39 = vpop.f32.mrb[23].mxu1 }
 0x98e   :  { %v883_v40 = vpack.c.bf16 %v879_v39, %v875_v36 }
 0x990   :  { %1236 = vmatprep.mubr.bf16.mxu1 %v883_v40  ;;  %1279 = vmatprep.mubr.bf16.mxu0 %v883_v40 }
 0x991   :  { %1237 = vmatmul.mubr.bf16.vlgmr.msra.gmra.mrb[24].mxu1 %v882_v38  ;;  %1280 = vmatmul.mubr.bf16.vlgmr.msra.gmra.mrb[20].mxu0 %v882_v38 }
 0x992   :  { %1976 = vmatpush3.bf16.msra.mxu1 %v2225_v41  ;;  %1998 = vmatpush3.bf16.msra.mxu0 %v2226_v42 }
 0x993   :  { %1977 = vmatprep.subr.bf16.mxu1 %v2227_v43  ;;  %1999 = vmatprep.subr.bf16.mxu0 %v2228_v44 }
 0x996   :  { %1978 = vmatpush3.bf16.msra.mxu1 %v2229_v45  ;;  %2000 = vmatpush3.bf16.msra.mxu0 %v2230_v46 }
 0x997   :  { %1979 = vmatprep.subr.bf16.mxu1 %v2231_v47  ;;  %2001 = vmatprep.subr.bf16.mxu0 %v2232_v48 }
 0x99a   :  { %1980 = vmatpush3.bf16.msra.mxu1 %v2233_v49  ;;  %2002 = vmatpush3.bf16.msra.mxu0 %v2234_v50 }
 0x99b   :  { %1981 = vmatprep.subr.bf16.mxu1 %v2235_v51  ;;  %2003 = vmatprep.subr.bf16.mxu0 %v2236_v52 }
 0x99e   :  { %1982 = vmatpush3.bf16.msra.mxu1 %v2237_v53  ;;  %2004 = vmatpush3.bf16.msra.mxu0 %v2238_v54 }
 0x99f   :  { %1983 = vmatprep.subr.bf16.mxu1 %v2239_v55  ;;  %2005 = vmatprep.subr.bf16.mxu0 %v2240_v56 }
 0x9a2   :  { %1984 = vmatpush3.bf16.msra.mxu1 %v2241_v57  ;;  %2006 = vmatpush3.bf16.msra.mxu0 %v2242_v58 }
 0x9a3   :  { %1985 = vmatprep.subr.bf16.mxu1 %v2243_v59  ;;  %2007 = vmatprep.subr.bf16.mxu0 %v2244_v60 }
 0x9a6   :  { %1986 = vmatpush3.bf16.msra.mxu1 %v2245_v61  ;;  %2008 = vmatpush3.bf16.msra.mxu0 %v2246_v62 }
 0x9a7   :  { %1987 = vmatprep.subr.bf16.mxu1 %v2247_v63  ;;  %2009 = vmatprep.subr.bf16.mxu0 %v2248_v1 }
 0x9aa   :  { %1988 = vmatpush3.bf16.msra.mxu1 %v2249_v2  ;;  %2010 = vmatpush3.bf16.msra.mxu0 %v2250_v3 }
 0x9ab   :  { %1989 = vmatprep.subr.bf16.mxu1 %v2251_v5  ;;  %2011 = vmatprep.subr.bf16.mxu0 %v2252_v6 }
 0x9ae   :  { %1990 = vmatpush3.bf16.msra.mxu1 %v2253_v4  ;;  %2012 = vmatpush3.bf16.msra.mxu0 %v2254_v7 }
 0x9af   :  { %2083 = vmatprep.subr.bf16.mxu1 %v2291_v0 }
 0xa64   :  { %v1238_v31 = vpop.f32.mrb[24].mxu1  ;;  %v1281_v32 = vpop.f32.mrb[20].mxu0 }
 0xa65   :  { %v1327_v30 = vmul.f32 %v1314_v24, %v1238_v31  ;;  %v1329_v34 = vmul.f32 %v1322_v25, %v1281_v32  ;;  %v1240_v35 = vpop.f32.mrb[25].mxu1  ;;  %v1283_v36 = vpop.f32.mrb[21].mxu0 }
 0xa66   :  { %v1328_v37 = vmul.f32 %v1318_v26, %v1240_v35  ;;  %v1330_v38 = vmul.f32 %v1326_v27, %v1283_v36  ;;  %v1242_v39 = vpop.f32.mrb[26].mxu1  ;;  %v1285_v40 = vpop.f32.mrb[22].mxu0 }
 0xa67   :  { %v1371_v41 = vadd.f32 %v1358_v28, %v1327_v30  ;;  %v1373_v42 = vadd.f32 %v1366_v29, %v1329_v34  ;;  %v1331_v43 = vmul.f32 %v1314_v24, %v1242_v39  ;;  %v1333_v44 = vmul.f32 %v1322_v25, %v1285_v40  ;;  %v1244_v45 = vpop.f32.mrb[27].mxu1  ;;  %v1287_v46 = vpop.f32.mrb[23].mxu0 }
 0xa68   :  { %v1372_v47 = vadd.f32 %v1362_v33, %v1328_v37  ;;  %v1374_v48 = vadd.f32 %v1370_v13, %v1330_v38  ;;  %v1332_v49 = vmul.f32 %v1318_v26, %v1244_v45  ;;  %v1334_v50 = vmul.f32 %v1326_v27, %v1287_v46 }
 0xa69   :  { %v1375_v51 = vadd.f32 %v1358_v28, %v1331_v43  ;;  %v1377_v52 = vadd.f32 %v1366_v29, %v1333_v44  ;;  %v1379_v55 = vmax.f32 %v1371_v41, 0.0  ;;  %v1381_v56 = vmax.f32 %v1373_v42, 0.0 }
 0xa6a   :  { %v1376_v53 = vadd.f32 %v1362_v33, %v1332_v49  ;;  %v1378_v54 = vadd.f32 %v1370_v13, %v1334_v50  ;;  %v1380_v59 = vmax.f32 %v1372_v47, 0.0  ;;  %v1382_v60 = vmax.f32 %v1374_v48, 0.0 }
 0xa6b   :  { %v1383_v57 = vmax.f32 %v1375_v51, 0.0  ;;  %v1385_v58 = vmax.f32 %v1377_v52, 0.0  ;;  %v1782_v24 = vrot.slane %v1919_v22, %v2399_v16 }
 0xa6c   :  { %v1384_v61 = vmax.f32 %v1376_v53, 0.0  ;;  %v1386_v62 = vmax.f32 %v1378_v54, 0.0 }
 0xa6d   :  { %v1453_v63 = vpack.c.bf16 %v1383_v57, %v1379_v55  ;;  %v1455_v1 = vpack.c.bf16 %v1385_v58, %v1381_v56 }
 0xa6e   :  { %v1454_v2 = vpack.c.bf16 %v1384_v61, %v1380_v59  ;;  %v1456_v3 = vpack.c.bf16 %v1386_v62, %v1382_v60 }
 0xa70   :  { %1681 = vmatprep.mubr.bf16.mxu1 %v1454_v2  ;;  %1722 = vmatprep.mubr.bf16.mxu0 %v1456_v3 }
 0xa71   :  { %1682 = vmatmul.mubr.bf16.vlgmr.msra.gmra.mrb[28].mxu1 %v1453_v63  ;;  %1723 = vmatmul.mubr.bf16.vlgmr.msra.gmra.mrb[24].mxu0 %v1455_v1 }
 0xa72   :  { %2085 = vmatprep.mubr.msk.bf16.mxu1 %vm2292_vm0, %v2291_v0  ;;  %v2263_v0 = vld [vmem:[%s2673_s0] sm:$0xff]  }
 0xb44   :  { %v1991_v5 = vpop.f32.mrb[28].mxu1  ;;  %v2013_v6 = vpop.f32.mrb[24].mxu0 }
 0xb45   :  { %v1992_v4 = vpop.f32.mrb[29].mxu1  ;;  %v2014_v7 = vpop.f32.mrb[25].mxu0 }
 0xb46   :  { %v1993_v8 = vadd.f32 %v1992_v4, %v1991_v5  ;;  %v2015_v9 = vadd.f32 %v2014_v7, %v2013_v6  ;;  %v1994_v10 = vpop.f32.mrb[30].mxu1  ;;  %v2016_v11 = vpop.f32.mrb[26].mxu0 }
 0xb47   :  { %v1995_v12 = vpop.f32.mrb[31].mxu1  ;;  %v2017_v15 = vpop.f32.mrb[27].mxu0 }
 0xb48   :  { %v1725_v17 = vadd.f32 %v2015_v9, %v1993_v8  ;;  %v1996_v18 = vadd.f32 %v1995_v12, %v1994_v10  ;;  %v2018_v19 = vadd.f32 %v2017_v15, %v2016_v11 }
 0xb4a   :  { %v1728_v20 = vadd.f32 %v2018_v19, %v1996_v18 }
 0xb4c   :  { %v1731_v21 = vpack.c.bf16 %v1728_v20, %v1725_v17 }
 0xb4e   :  { %2084 = vmatpush3.bf16.msra.mxu1 %v1731_v21 }
 0xb51   :  { %2086 = vmatmul.mubr.msk.bf16.vlgmr.msra.gmra.mrb[32].mxu1 %vm62_vm1, %v2263_v0 }
 0xc24   :  { %v1766_v25 = vpop.f32.mrb[32].mxu1 }
 0xc25   :  { %v1777_v26 = vmul.f32 %v1776_v23, %v1766_v25  ;;  %v2087_v27 = vpop.f32.mrb[33].mxu1 }
 0xc26   :  { %v1769_v28 = vpop.f32.mrb[34].mxu1 }
 0xc27   :  { %v1778_v29 = vmul.f32 %v1776_v23, %v1769_v28  ;;  %v2088_v31 = vpop.f32.mrb[35].mxu1  ;;  %v1783_v32 = vadd.f32 %v1782_v24, %v1777_v26 }
 0xc29   :  { %v1785_v33 = vsel %vm108_vm3, %v1783_v32, -inf  ;;  %v1784_v13 = vadd.f32 %v1782_v24, %v1778_v29 }
 0xc2a   :  { %1786 = vmax.xlane.f32.xlu0 %v1785_v33 }
 0xc2b   :  { %v1788_v30 = vsel %vm108_vm3, %v1784_v13, -inf }
 0xc2e   :  { %1789 = vmax.xlane.f32.xlu0 %v1788_v30 }
 0xcb7   :  { %v1787_v34 = vpop.xlane.xlu0 %1786 }
 0xcb8   :  { %v1791_v35 = vsub.f32 %v1783_v32, %v1787_v34 }
 0xcba   :  { %v1793_v36 = vmul.f32 1.442695, %v1791_v35 }
 0xcbb   :  { %v1790_v14 = vpop.xlane.xlu0 %1789 }
 0xcbc   :  { %2255 = vpow2.f32 %v1793_v36  ;;  %v1792_v16 = vsub.f32 %v1784_v13, %v1790_v14 }
 0xcbe   :  { %v1795_v37 = vmul.f32 1.442695, %v1792_v16 }
 0xcc0   :  { %2257 = vpow2.f32 %v1795_v37 }
 0xcc6   :  { %v2256_v38 = vpop.eup %2255 }
 0xcc7   :  { %v1797_v39 = vsel %vm108_vm3, %v2256_v38, 0.0 }
 0xcc8   :  { %1798 = vadd.xlane.f32.xlu1 %v1797_v39 }
 0xcca   :  { %v2258_v40 = vpop.eup %2257 }
 0xccb   :  { %v1800_v41 = vsel %vm108_vm3, %v2258_v40, 0.0 }
 0xccc   :  { %1801 = vadd.xlane.f32.xlu1 %v1800_v41 }
 0xd55   :  { %v1799_v42 = vpop.xlane.xlu1 %1798 }
 0xd56   :  { %2259 = vlog2.f32 %v1799_v42 }
 0xd59   :  { %v1802_v43 = vpop.xlane.xlu1 %1801 }
 0xd5a   :  { %2261 = vlog2.f32 %v1802_v43 }
 0xd60   :  { %v2260_v44 = vpop.eup %2259 }
 0xd61   :  { %v1804_v45 = vmul.f32 0.6931472, %v2260_v44 }
 0xd63   :  { %v1807_v46 = vsub.f32 %v1791_v35, %v1804_v45 }
 0xd64   :  { %v2262_v47 = vpop.eup %2261 }
 0xd65   :  { %1809 = vst.msk [vmem:[%s2683_s10] sm:$0xff] %vm108_vm3, %v1807_v46  ;;  %v1806_v48 = vmul.f32 0.6931472, %v2262_v47 }
 0xd67   :  { %v1808_v49 = vsub.f32 %v1792_v16, %v1806_v48 }
 0xd69   :  { %1810 = vst.msk [vmem:[%s2683_s10 + $0x8] sm:$0xff] %vm108_vm3, %v1808_v49 }
 0xd6a   :  { %1815 = vsyncpa [#allocation3], 1 }

</bundles_post_ra>
